<compile_context>
chip_gen: v5e
topology: v5e:2x2
jax: 0.10.0
libtpu: 0.0.40
codegen_flags: <defaults>
</compile_context>

<pallas_src>
import functools

import numpy as np
import jax
import jax.numpy as jnp
from jax import lax
from jax.experimental import pallas as pl
from jax.experimental.pallas import tpu as pltpu


# ----------------------------- Pallas kernel --------------------------------

def _layernorm(t, g, b, eps=1e-5):
    mu = jnp.mean(t, axis=-1, keepdims=True)
    var = jnp.mean((t - mu) ** 2, axis=-1, keepdims=True)
    return (t - mu) * lax.rsqrt(var + eps) * g + b


def cross_atten_kernel(tok_ref, pos_ref, vec_ref,
                       w_emb_ref, wqkv_ref, wo_ref, wlin_ref,
                       out_ref, *,
                       n_queries, n_per_batch, heads, dim_head, dim, patch_dim):
    """Whole batch in one grid step.

    tok_ref : (2*B*n, patch_dim)  stacked [img tokens ; img_seg tokens]
    pos_ref : (2*B*n, dim)        positional embedding tiled over (stream, batch)
    vec_ref : (8, max(dim,patch_dim)) packed row vectors:
              row0 b_emb (ln1 bias folded), row1 ln2_g, row2 ln2_b, row3 bo, row4 blin
    w_emb   : (patch_dim, dim) bf16, ln1 gain folded in
    wqkv    : (dim, 3*inner)  bf16, [wq*scale | wk | wv]
    wo      : (inner, dim)    bf16
    wlin    : (dim, patch_dim) bf16
    """
    inner = heads * dim_head
    nq = n_queries

    vecs = vec_ref[...]
    b_emb = vecs[0:1, :dim]
    ln2_g = vecs[1:2, :dim]
    ln2_b = vecs[2:3, :dim]
    bo = vecs[3:4, :dim]
    blin = vecs[4:5, :patch_dim]

    # ---- shared patch embedding for both streams (bf16 MXU, f32 accumulate) ----
    # First LayerNorm is normalization-only: its affine is folded into w_emb/b_emb.
    tok = tok_ref[...]
    mu = jnp.mean(tok, axis=-1, keepdims=True)
    var = jnp.mean((tok - mu) ** 2, axis=-1, keepdims=True)
    tnorm = (tok - mu) * lax.rsqrt(var + 1e-5)
    t = jnp.dot(tnorm.astype(jnp.bfloat16), w_emb_ref[...],
                preferred_element_type=jnp.float32) + b_emb
    mu2 = jnp.mean(t, axis=-1, keepdims=True)
    var2 = jnp.mean((t - mu2) ** 2, axis=-1, keepdims=True)
    t = (t - mu2) * lax.rsqrt(var2 + 1e-5) * ln2_g + ln2_b
    t = t + pos_ref[...]

    x_emb = t[:nq].astype(jnp.bfloat16)          # queries from img      (B*n, dim)
    y_emb = t[nq:].astype(jnp.bfloat16)          # keys/values from seg  (B*n, dim)

    # ---- fused q / kv projections (2 MXU pushes instead of 12) ----
    wqkv = wqkv_ref[...]
    q_all = jnp.dot(x_emb, wqkv[:, :inner], preferred_element_type=jnp.float32)
    kv_all = jnp.dot(y_emb, wqkv[:, inner:], preferred_element_type=jnp.float32)

    # ---- block-diagonal batch mask generated in-kernel (pure VPU, no DMA) ----
    rid = lax.broadcasted_iota(jnp.int32, (nq, nq), 0).astype(jnp.float32)
    cid = lax.broadcasted_iota(jnp.int32, (nq, nq), 1).astype(jnp.float32)
    inv_n = 1.0 / n_per_batch
    same_batch = (jnp.floor((rid + 0.5) * inv_n)
                  == jnp.floor((cid + 0.5) * inv_n))

    # ---- multi-head attention (static unroll; per-head slices are 8-lane) ----
    heads_out = []
    for h in range(heads):
        lo = h * dim_head
        qh = q_all[:, lo:lo + dim_head].astype(jnp.bfloat16)
        kh = kv_all[:, lo:lo + dim_head].astype(jnp.bfloat16)
        vh = kv_all[:, inner + lo:inner + lo + dim_head].astype(jnp.bfloat16)
        dots = lax.dot_general(qh, kh, (((1,), (1,)), ((), ())),
                               preferred_element_type=jnp.float32)
        dots = jnp.where(same_batch, dots, -1e30)
        dots = dots - jnp.max(dots, axis=-1, keepdims=True)
        e = jnp.exp(dots)
        attn = e * pl.reciprocal(jnp.sum(e, axis=-1, keepdims=True), approx=True)
        heads_out.append(jnp.dot(attn.astype(jnp.bfloat16), vh,
                                 preferred_element_type=jnp.float32))
    o_all = jnp.concatenate(heads_out, axis=-1)              # (B*n, inner) f32

    # ---- fused output projection + final linear ----
    o = jnp.dot(o_all.astype(jnp.bfloat16), wo_ref[...],
                preferred_element_type=jnp.float32) + bo     # (B*n, dim)
    out_ref[...] = jnp.dot(o.astype(jnp.bfloat16), wlin_ref[...],
                           preferred_element_type=jnp.float32) + blin


# ----------------------------- JAX wrapper -----------------------------------

def _to_patches(t, patch):
    # 'b c (h p1) (w p2) -> b (h w) (p1 p2 c)'
    B, C, H, W = t.shape
    hh, ww = H // patch, W // patch
    t = t.reshape(B, C, hh, patch, ww, patch)
    t = t.transpose(0, 2, 4, 3, 5, 1)            # b h w p1 p2 c
    return t.reshape(B, hh * ww, patch * patch * C)


def _to_original(t, patch, hh, ww, C):
    # 'b (h w) (p1 p2 c) -> b c (h p1) (w p2)'
    B = t.shape[0]
    t = t.reshape(B, hh, ww, patch, patch, C)
    t = t.transpose(0, 5, 1, 3, 2, 4)            # b c h p1 w p2
    return t.reshape(B, C, hh * patch, ww * patch)


def _cost_estimate(B, n, patch_dim, dim, inner, heads, dim_head):
    BN = B * n
    flops = 2 * (2 * BN * patch_dim * dim          # patch embedding (both streams)
                 + 3 * BN * dim * inner            # fused q + kv
                 + 2 * heads * BN * BN * dim_head  # qk^T and attn@v
                 + BN * inner * dim                # output projection
                 + BN * dim * patch_dim)           # final linear
    transcendentals = heads * BN * BN              # exp
    bytes_accessed = (4 * (2 * BN * patch_dim      # tokens
                           + 2 * BN * dim          # pos
                           + 8 * max(dim, patch_dim)   # packed vectors
                           + BN * patch_dim)       # output
                      + 2 * (patch_dim * dim + dim * 3 * inner
                             + inner * dim + dim * patch_dim))  # bf16 weights
    return pl.CostEstimate(flops=int(flops),
                           transcendentals=int(transcendentals),
                           bytes_accessed=int(bytes_accessed))


def cross_atten_forward(img, img_seg, params, *, patch_size, heads, dim_head):
    B, C, H, W = img.shape
    hh, ww = H // patch_size, W // patch_size
    n = hh * ww
    patch_dim = patch_size * patch_size * C
    dim = params['w_emb'].shape[1]
    inner = heads * dim_head
    scale = dim_head ** -0.5
    BN = B * n

    # Stack both streams row-wise so the embedding path runs once.
    xp = _to_patches(img, patch_size).reshape(BN, patch_dim)
    yp = _to_patches(img_seg, patch_size).reshape(BN, patch_dim)
    tokens = jnp.concatenate([xp, yp], axis=0)                  # (2*B*n, patch_dim)

    pos = jnp.tile(params['pos'][:n], (2 * B, 1))               # (2*B*n, dim)

    # Fold the first LayerNorm affine into the embedding weights (host-side, once).
    w_emb = (params['w_emb'] * params['ln1_g'].reshape(patch_dim, 1)
             ).astype(jnp.bfloat16)
    b_emb = params['b_emb'] + params['ln1_b'] @ params['w_emb']  # (1, dim) f32

    # Fused q/k/v weight, softmax scale folded into the q block; bf16 for the MXU.
    wqkv = jnp.concatenate([params['wq'] * scale, params['wkv']],
                           axis=1).astype(jnp.bfloat16)          # (dim, 3*inner)
    wo = params['wo'].astype(jnp.bfloat16)                       # (inner, dim)
    wlin = params['wlin'].astype(jnp.bfloat16)                   # (dim, patch_dim)

    # Pack all (1, X) row-vector params into a single (8, vec_w) array (one DMA).
    vec_w = max(dim, patch_dim)
    vecs = jnp.zeros((8, vec_w), jnp.float32)
    vecs = vecs.at[0, :dim].set(b_emb[0])
    vecs = vecs.at[1, :dim].set(params['ln2_g'][0])
    vecs = vecs.at[2, :dim].set(params['ln2_b'][0])
    vecs = vecs.at[3, :dim].set(params['bo'][0])
    vecs = vecs.at[4, :patch_dim].set(params['blin'][0])

    args = [tokens, pos, vecs, w_emb, wqkv, wo, wlin]

    kern = functools.partial(cross_atten_kernel, n_queries=BN, n_per_batch=n,
                             heads=heads, dim_head=dim_head, dim=dim,
                             patch_dim=patch_dim)

    def full_spec(a):
        shp = tuple(a.shape)
        return pl.BlockSpec(shp, lambda *_: (0,) * len(shp))

    out = pl.pallas_call(
        kern,
        out_shape=jax.ShapeDtypeStruct((BN, patch_dim), jnp.float32),
        grid=(1,),
        in_specs=[full_spec(a) for a in args],
        out_specs=pl.BlockSpec((BN, patch_dim), lambda i: (0, 0)),
        compiler_params=pltpu.CompilerParams(dimension_semantics=("arbitrary",)),
        cost_estimate=_cost_estimate(B, n, patch_dim, dim, inner, heads, dim_head),
    )(*args)

    return _to_original(out.reshape(B, n, patch_dim), patch_size, hh, ww, C)


# --------------------------- pure-JAX reference -------------------------------

def reference_forward(img, img_seg, params, *, patch_size, heads, dim_head):
    B, C, H, W = img.shape
    hh, ww = H // patch_size, W // patch_size
    inner = heads * dim_head
    scale = dim_head ** -0.5

    def embed(tok):
        t = _layernorm(tok, params['ln1_g'][0], params['ln1_b'][0])
        t = t @ params['w_emb'] + params['b_emb'][0]
        t = _layernorm(t, params['ln2_g'][0], params['ln2_b'][0])
        return t + params['pos'][None]

    x = embed(_to_patches(img, patch_size))
    y = embed(_to_patches(img_seg, patch_size))
    q = x @ params['wq']
    kv = y @ params['wkv']
    k, v = kv[..., :inner], kv[..., inner:]

    def split_heads(t):  # b n (h d) -> b h n d
        b, nn, _ = t.shape
        return t.reshape(b, nn, heads, dim_head).transpose(0, 2, 1, 3)

    qh, kh, vh = split_heads(q), split_heads(k), split_heads(v)
    dots = jnp.einsum('bhnd,bhmd->bhnm', qh, kh) * scale
    attn = jax.nn.softmax(dots, axis=-1)
    o = jnp.einsum('bhnm,bhmd->bhnd', attn, vh)
    o = o.transpose(0, 2, 1, 3).reshape(x.shape[0], x.shape[1], inner)
    o = o @ params['wo'] + params['bo'][0]
    o = o @ params['wlin'] + params['blin'][0]
    return _to_original(o, patch_size, hh, ww, C)


# ------------------------------- main -----------------------------------------

def make_params(key, *, patch_dim, dim, heads, dim_head, num_patches):
    inner = heads * dim_head
    ks = jax.random.split(key, 16)
    f32 = jnp.float32
    return {
        'ln1_g': 1.0 + 0.1 * jax.random.normal(ks[0], (1, patch_dim), f32),
        'ln1_b': 0.1 * jax.random.normal(ks[1], (1, patch_dim), f32),
        'w_emb': 0.05 * jax.random.normal(ks[2], (patch_dim, dim), f32),
        'b_emb': 0.05 * jax.random.normal(ks[3], (1, dim), f32),
        'ln2_g': 1.0 + 0.1 * jax.random.normal(ks[4], (1, dim), f32),
        'ln2_b': 0.1 * jax.random.normal(ks[5], (1, dim), f32),
        # pos_embedding is (1, num_patches+1, dim); forward uses [:, :n]
        'pos':   jax.random.normal(ks[6], (num_patches + 1, dim), f32)[:num_patches],
        'wq':    0.05 * jax.random.normal(ks[7], (dim, inner), f32),
        'wkv':   0.05 * jax.random.normal(ks[8], (dim, 2 * inner), f32),
        'wo':    0.05 * jax.random.normal(ks[9], (inner, dim), f32),
        'bo':    0.05 * jax.random.normal(ks[10], (1, dim), f32),
        'wlin':  0.05 * jax.random.normal(ks[11], (dim, patch_dim), f32),
        'blin':  0.05 * jax.random.normal(ks[12], (1, patch_dim), f32),
    }


if __name__ == "__main__":
    # Small config consistent with the module:
    # image_size=16, patch_size=8, channels=4, dim=32, heads=4, dim_head=8
    # mask_num=4, embedding_scale_factor=1 -> patch_dim = 4*8*8 = 256, num_patches = 4
    B, C, H, W = 2, 4, 16, 16
    patch_size, dim, heads, dim_head = 8, 32, 4, 8
    num_patches = (H // patch_size) * (W // patch_size)
    patch_dim = C * patch_size * patch_size

    key = jax.random.PRNGKey(0)
    k_img, k_seg, k_par = jax.random.split(key, 3)
    img = jax.random.normal(k_img, (B, C, H, W), jnp.float32)
    img_seg = jax.random.normal(k_seg, (B, C, H, W), jnp.float32)
    params = make_params(k_par, patch_dim=patch_dim, dim=dim, heads=heads,
                         dim_head=dim_head, num_patches=num_patches)

    out = cross_atten_forward(img, img_seg, params, patch_size=patch_size,
                              heads=heads, dim_head=dim_head)
    out = jax.block_until_ready(out)
    assert out.shape == (B, C, H, W), out.shape

    ref = reference_forward(img, img_seg, params, patch_size=patch_size,
                            heads=heads, dim_head=dim_head)
    np.testing.assert_allclose(np.asarray(out), np.asarray(ref),
                               rtol=5e-2, atol=5e-2)

    print("KERNEL_OK")
</pallas_src>

<mosaic_0001>
module attributes {stable_mosaic.version = 11 : i64} {
  func.func @cross_atten_kernel(%arg0: i32, %arg1: memref<16x256xf32, #tpu.memory_space<vmem>>, %arg2: memref<16x32xf32, #tpu.memory_space<vmem>>, %arg3: memref<8x256xf32, #tpu.memory_space<vmem>>, %arg4: memref<256x32xbf16, #tpu.memory_space<vmem>>, %arg5: memref<32x96xbf16, #tpu.memory_space<vmem>>, %arg6: memref<32x32xbf16, #tpu.memory_space<vmem>>, %arg7: memref<32x256xbf16, #tpu.memory_space<vmem>>, %arg8: memref<8x256xf32, #tpu.memory_space<vmem>>) attributes {dimension_semantics = [#tpu.dimension_semantics<arbitrary>], iteration_bounds = array<i64: 1>, scalar_prefetch = 0 : i64, scratch_operands = 0 : i64, tpu.core_type = #tpu.core_type<tc>, window_params = [{pipeline_mode = #tpu.pipeline_mode<synchronous>, transform_indices = @transform_0, window_bounds = array<i64: 16, 256>}, {pipeline_mode = #tpu.pipeline_mode<synchronous>, transform_indices = @transform_1, window_bounds = array<i64: 16, 32>}, {pipeline_mode = #tpu.pipeline_mode<synchronous>, transform_indices = @transform_2, window_bounds = array<i64: 8, 256>}, {pipeline_mode = #tpu.pipeline_mode<synchronous>, transform_indices = @transform_3, window_bounds = array<i64: 256, 32>}, {pipeline_mode = #tpu.pipeline_mode<synchronous>, transform_indices = @transform_4, window_bounds = array<i64: 32, 96>}, {pipeline_mode = #tpu.pipeline_mode<synchronous>, transform_indices = @transform_5, window_bounds = array<i64: 32, 32>}, {pipeline_mode = #tpu.pipeline_mode<synchronous>, transform_indices = @transform_6, window_bounds = array<i64: 32, 256>}, {pipeline_mode = #tpu.pipeline_mode<synchronous>, transform_indices = @transform_7, window_bounds = array<i64: 8, 256>}]} {
    %c0 = arith.constant 0 : index
    %c0_0 = arith.constant 0 : index
    %0 = vector.load %arg3[%c0, %c0_0] : memref<8x256xf32, #tpu.memory_space<vmem>>, vector<8x256xf32>
    %1 = vector.extract_strided_slice %0 {offsets = [0, 0], sizes = [1, 32], strides = [1, 1]} : vector<8x256xf32> to vector<1x32xf32>
    %2 = vector.extract_strided_slice %0 {offsets = [1, 0], sizes = [1, 32], strides = [1, 1]} : vector<8x256xf32> to vector<1x32xf32>
    %3 = vector.extract_strided_slice %0 {offsets = [2, 0], sizes = [1, 32], strides = [1, 1]} : vector<8x256xf32> to vector<1x32xf32>
    %4 = vector.extract_strided_slice %0 {offsets = [3, 0], sizes = [1, 32], strides = [1, 1]} : vector<8x256xf32> to vector<1x32xf32>
    %5 = vector.extract_strided_slice %0 {offsets = [4, 0], sizes = [1, 256], strides = [1, 1]} : vector<8x256xf32> to vector<1x256xf32>
    %c0_1 = arith.constant 0 : index
    %c0_2 = arith.constant 0 : index
    %6 = vector.load %arg1[%c0_1, %c0_2] : memref<16x256xf32, #tpu.memory_space<vmem>>, vector<16x256xf32>
    %cst = arith.constant dense<0.000000e+00> : vector<16xf32>
    %7 = vector.multi_reduction <add>, %6, %cst [1] : vector<16x256xf32> to vector<16xf32>
    %8 = vector.shape_cast %7 : vector<16xf32> to vector<16x1xf32>
    %cst_3 = arith.constant 2.560000e+02 : f32
    %9 = vector.broadcast %cst_3 : f32 to vector<16x1xf32>
    %10 = arith.divf %8, %9 : vector<16x1xf32>
    %11 = vector.broadcast %10 : vector<16x1xf32> to vector<16x256xf32>
    %12 = arith.subf %6, %11 : vector<16x256xf32>
    %13 = arith.mulf %12, %12 : vector<16x256xf32>
    %cst_4 = arith.constant dense<0.000000e+00> : vector<16xf32>
    %14 = vector.multi_reduction <add>, %13, %cst_4 [1] : vector<16x256xf32> to vector<16xf32>
    %15 = vector.shape_cast %14 : vector<16xf32> to vector<16x1xf32>
    %cst_5 = arith.constant 2.560000e+02 : f32
    %16 = vector.broadcast %cst_5 : f32 to vector<16x1xf32>
    %17 = arith.divf %15, %16 : vector<16x1xf32>
    %18 = vector.broadcast %10 : vector<16x1xf32> to vector<16x256xf32>
    %19 = arith.subf %6, %18 : vector<16x256xf32>
    %cst_6 = arith.constant 9.99999974E-6 : f32
    %20 = vector.broadcast %cst_6 : f32 to vector<16x1xf32>
    %21 = arith.addf %17, %20 : vector<16x1xf32>
    %22 = math.rsqrt %21 : vector<16x1xf32>
    %23 = vector.broadcast %22 : vector<16x1xf32> to vector<16x256xf32>
    %24 = arith.mulf %19, %23 : vector<16x256xf32>
    %25 = arith.truncf %24 : vector<16x256xf32> to vector<16x256xbf16>
    %c0_7 = arith.constant 0 : index
    %c0_8 = arith.constant 0 : index
    %26 = vector.load %arg4[%c0_7, %c0_8] : memref<256x32xbf16, #tpu.memory_space<vmem>>, vector<256x32xbf16>
    %cst_9 = arith.constant dense<0.000000e+00> : vector<16x32xf32>
    %27 = tpu.matmul %25, %26, %cst_9 {dimension_numbers = #tpu.dot_dimension_numbers<[1], [0], [0], [1], [0, 0, 1, 1], [], []>} : vector<16x256xbf16>, vector<256x32xbf16>, vector<16x32xf32> -> vector<16x32xf32>
    %28 = vector.broadcast %1 : vector<1x32xf32> to vector<16x32xf32>
    %29 = arith.addf %27, %28 : vector<16x32xf32>
    %cst_10 = arith.constant dense<0.000000e+00> : vector<16xf32>
    %30 = vector.multi_reduction <add>, %29, %cst_10 [1] : vector<16x32xf32> to vector<16xf32>
    %31 = vector.shape_cast %30 : vector<16xf32> to vector<16x1xf32>
    %cst_11 = arith.constant 3.200000e+01 : f32
    %32 = vector.broadcast %cst_11 : f32 to vector<16x1xf32>
    %33 = arith.divf %31, %32 : vector<16x1xf32>
    %34 = vector.broadcast %33 : vector<16x1xf32> to vector<16x32xf32>
    %35 = arith.subf %29, %34 : vector<16x32xf32>
    %36 = arith.mulf %35, %35 : vector<16x32xf32>
    %cst_12 = arith.constant dense<0.000000e+00> : vector<16xf32>
    %37 = vector.multi_reduction <add>, %36, %cst_12 [1] : vector<16x32xf32> to vector<16xf32>
    %38 = vector.shape_cast %37 : vector<16xf32> to vector<16x1xf32>
    %cst_13 = arith.constant 3.200000e+01 : f32
    %39 = vector.broadcast %cst_13 : f32 to vector<16x1xf32>
    %40 = arith.divf %38, %39 : vector<16x1xf32>
    %41 = vector.broadcast %33 : vector<16x1xf32> to vector<16x32xf32>
    %42 = arith.subf %29, %41 : vector<16x32xf32>
    %cst_14 = arith.constant 9.99999974E-6 : f32
    %43 = vector.broadcast %cst_14 : f32 to vector<16x1xf32>
    %44 = arith.addf %40, %43 : vector<16x1xf32>
    %45 = math.rsqrt %44 : vector<16x1xf32>
    %46 = vector.broadcast %45 : vector<16x1xf32> to vector<16x32xf32>
    %47 = arith.mulf %42, %46 : vector<16x32xf32>
    %48 = vector.broadcast %2 : vector<1x32xf32> to vector<16x32xf32>
    %49 = arith.mulf %47, %48 : vector<16x32xf32>
    %50 = vector.broadcast %3 : vector<1x32xf32> to vector<16x32xf32>
    %51 = arith.addf %49, %50 : vector<16x32xf32>
    %c0_15 = arith.constant 0 : index
    %c0_16 = arith.constant 0 : index
    %52 = vector.load %arg2[%c0_15, %c0_16] : memref<16x32xf32, #tpu.memory_space<vmem>>, vector<16x32xf32>
    %53 = arith.addf %51, %52 : vector<16x32xf32>
    %54 = vector.extract_strided_slice %53 {offsets = [0, 0], sizes = [8, 32], strides = [1, 1]} : vector<16x32xf32> to vector<8x32xf32>
    %55 = arith.truncf %54 : vector<8x32xf32> to vector<8x32xbf16>
    %56 = vector.extract_strided_slice %53 {offsets = [8, 0], sizes = [8, 32], strides = [1, 1]} : vector<16x32xf32> to vector<8x32xf32>
    %57 = arith.truncf %56 : vector<8x32xf32> to vector<8x32xbf16>
    %c0_17 = arith.constant 0 : index
    %c0_18 = arith.constant 0 : index
    %58 = vector.load %arg5[%c0_17, %c0_18] : memref<32x96xbf16, #tpu.memory_space<vmem>>, vector<32x96xbf16>
    %59 = vector.extract_strided_slice %58 {offsets = [0, 0], sizes = [32, 32], strides = [1, 1]} : vector<32x96xbf16> to vector<32x32xbf16>
    %cst_19 = arith.constant dense<0.000000e+00> : vector<8x32xf32>
    %60 = tpu.matmul %55, %59, %cst_19 {dimension_numbers = #tpu.dot_dimension_numbers<[1], [0], [0], [1], [0, 0, 1, 1], [], []>} : vector<8x32xbf16>, vector<32x32xbf16>, vector<8x32xf32> -> vector<8x32xf32>
    %61 = vector.extract_strided_slice %58 {offsets = [0, 32], sizes = [32, 64], strides = [1, 1]} : vector<32x96xbf16> to vector<32x64xbf16>
    %cst_20 = arith.constant dense<0.000000e+00> : vector<8x64xf32>
    %62 = tpu.matmul %57, %61, %cst_20 {dimension_numbers = #tpu.dot_dimension_numbers<[1], [0], [0], [1], [0, 0, 1, 1], [], []>} : vector<8x32xbf16>, vector<32x64xbf16>, vector<8x64xf32> -> vector<8x64xf32>
    %63 = tpu.iota {dimensions = array<i32: 0>} : vector<8x8xi32>
    %64 = arith.sitofp %63 : vector<8x8xi32> to vector<8x8xf32>
    %65 = tpu.iota {dimensions = array<i32: 1>} : vector<8x8xi32>
    %66 = arith.sitofp %65 : vector<8x8xi32> to vector<8x8xf32>
    %cst_21 = arith.constant 5.000000e-01 : f32
    %67 = vector.broadcast %cst_21 : f32 to vector<8x8xf32>
    %68 = arith.addf %64, %67 : vector<8x8xf32>
    %cst_22 = arith.constant 2.500000e-01 : f32
    %69 = vector.broadcast %cst_22 : f32 to vector<8x8xf32>
    %70 = arith.mulf %68, %69 : vector<8x8xf32>
    %71 = math.floor %70 : vector<8x8xf32>
    %cst_23 = arith.constant 5.000000e-01 : f32
    %72 = vector.broadcast %cst_23 : f32 to vector<8x8xf32>
    %73 = arith.addf %66, %72 : vector<8x8xf32>
    %cst_24 = arith.constant 2.500000e-01 : f32
    %74 = vector.broadcast %cst_24 : f32 to vector<8x8xf32>
    %75 = arith.mulf %73, %74 : vector<8x8xf32>
    %76 = math.floor %75 : vector<8x8xf32>
    %77 = arith.cmpf oeq, %71, %76 : vector<8x8xf32>
    %78 = vector.extract_strided_slice %60 {offsets = [0, 0], sizes = [8, 8], strides = [1, 1]} : vector<8x32xf32> to vector<8x8xf32>
    %79 = arith.truncf %78 : vector<8x8xf32> to vector<8x8xbf16>
    %80 = vector.extract_strided_slice %62 {offsets = [0, 0], sizes = [8, 8], strides = [1, 1]} : vector<8x64xf32> to vector<8x8xf32>
    %81 = arith.truncf %80 : vector<8x8xf32> to vector<8x8xbf16>
    %82 = vector.extract_strided_slice %62 {offsets = [0, 32], sizes = [8, 8], strides = [1, 1]} : vector<8x64xf32> to vector<8x8xf32>
    %83 = arith.truncf %82 : vector<8x8xf32> to vector<8x8xbf16>
    %cst_25 = arith.constant dense<0.000000e+00> : vector<8x8xf32>
    %84 = tpu.matmul %79, %81, %cst_25 {dimension_numbers = #tpu.dot_dimension_numbers<[1], [1], [0], [0], [0, 0, 1, 0], [], []>} : vector<8x8xbf16>, vector<8x8xbf16>, vector<8x8xf32> -> vector<8x8xf32>
    %cst_26 = arith.constant -1.000000e+30 : f32
    %85 = vector.broadcast %cst_26 : f32 to vector<8x8xf32>
    %86 = arith.select %77, %84, %85 : vector<8x8xi1>, vector<8x8xf32>
    %cst_27 = arith.constant dense<0xFF800000> : vector<8xf32>
    %87 = vector.multi_reduction <maximumf>, %86, %cst_27 [1] : vector<8x8xf32> to vector<8xf32>
    %88 = vector.shape_cast %87 : vector<8xf32> to vector<8x1xf32>
    %89 = vector.broadcast %88 : vector<8x1xf32> to vector<8x8xf32>
    %90 = arith.subf %86, %89 : vector<8x8xf32>
    %91 = math.exp %90 : vector<8x8xf32>
    %cst_28 = arith.constant dense<0.000000e+00> : vector<8xf32>
    %92 = vector.multi_reduction <add>, %91, %cst_28 [1] : vector<8x8xf32> to vector<8xf32>
    %93 = vector.shape_cast %92 : vector<8xf32> to vector<8x1xf32>
    %94 = tpu.reciprocal %93 {approx = true} : vector<8x1xf32> -> vector<8x1xf32>
    %95 = vector.broadcast %94 : vector<8x1xf32> to vector<8x8xf32>
    %96 = arith.mulf %91, %95 : vector<8x8xf32>
    %97 = arith.truncf %96 : vector<8x8xf32> to vector<8x8xbf16>
    %cst_29 = arith.constant dense<0.000000e+00> : vector<8x8xf32>
    %98 = tpu.matmul %97, %83, %cst_29 {dimension_numbers = #tpu.dot_dimension_numbers<[1], [0], [0], [1], [0, 0, 1, 1], [], []>} : vector<8x8xbf16>, vector<8x8xbf16>, vector<8x8xf32> -> vector<8x8xf32>
    %99 = vector.extract_strided_slice %60 {offsets = [0, 8], sizes = [8, 8], strides = [1, 1]} : vector<8x32xf32> to vector<8x8xf32>
    %100 = arith.truncf %99 : vector<8x8xf32> to vector<8x8xbf16>
    %101 = vector.extract_strided_slice %62 {offsets = [0, 8], sizes = [8, 8], strides = [1, 1]} : vector<8x64xf32> to vector<8x8xf32>
    %102 = arith.truncf %101 : vector<8x8xf32> to vector<8x8xbf16>
    %103 = vector.extract_strided_slice %62 {offsets = [0, 40], sizes = [8, 8], strides = [1, 1]} : vector<8x64xf32> to vector<8x8xf32>
    %104 = arith.truncf %103 : vector<8x8xf32> to vector<8x8xbf16>
    %cst_30 = arith.constant dense<0.000000e+00> : vector<8x8xf32>
    %105 = tpu.matmul %100, %102, %cst_30 {dimension_numbers = #tpu.dot_dimension_numbers<[1], [1], [0], [0], [0, 0, 1, 0], [], []>} : vector<8x8xbf16>, vector<8x8xbf16>, vector<8x8xf32> -> vector<8x8xf32>
    %cst_31 = arith.constant -1.000000e+30 : f32
    %106 = vector.broadcast %cst_31 : f32 to vector<8x8xf32>
    %107 = arith.select %77, %105, %106 : vector<8x8xi1>, vector<8x8xf32>
    %cst_32 = arith.constant dense<0xFF800000> : vector<8xf32>
    %108 = vector.multi_reduction <maximumf>, %107, %cst_32 [1] : vector<8x8xf32> to vector<8xf32>
    %109 = vector.shape_cast %108 : vector<8xf32> to vector<8x1xf32>
    %110 = vector.broadcast %109 : vector<8x1xf32> to vector<8x8xf32>
    %111 = arith.subf %107, %110 : vector<8x8xf32>
    %112 = math.exp %111 : vector<8x8xf32>
    %cst_33 = arith.constant dense<0.000000e+00> : vector<8xf32>
    %113 = vector.multi_reduction <add>, %112, %cst_33 [1] : vector<8x8xf32> to vector<8xf32>
    %114 = vector.shape_cast %113 : vector<8xf32> to vector<8x1xf32>
    %115 = tpu.reciprocal %114 {approx = true} : vector<8x1xf32> -> vector<8x1xf32>
    %116 = vector.broadcast %115 : vector<8x1xf32> to vector<8x8xf32>
    %117 = arith.mulf %112, %116 : vector<8x8xf32>
    %118 = arith.truncf %117 : vector<8x8xf32> to vector<8x8xbf16>
    %cst_34 = arith.constant dense<0.000000e+00> : vector<8x8xf32>
    %119 = tpu.matmul %118, %104, %cst_34 {dimension_numbers = #tpu.dot_dimension_numbers<[1], [0], [0], [1], [0, 0, 1, 1], [], []>} : vector<8x8xbf16>, vector<8x8xbf16>, vector<8x8xf32> -> vector<8x8xf32>
    %120 = vector.extract_strided_slice %60 {offsets = [0, 16], sizes = [8, 8], strides = [1, 1]} : vector<8x32xf32> to vector<8x8xf32>
    %121 = arith.truncf %120 : vector<8x8xf32> to vector<8x8xbf16>
    %122 = vector.extract_strided_slice %62 {offsets = [0, 16], sizes = [8, 8], strides = [1, 1]} : vector<8x64xf32> to vector<8x8xf32>
    %123 = arith.truncf %122 : vector<8x8xf32> to vector<8x8xbf16>
    %124 = vector.extract_strided_slice %62 {offsets = [0, 48], sizes = [8, 8], strides = [1, 1]} : vector<8x64xf32> to vector<8x8xf32>
    %125 = arith.truncf %124 : vector<8x8xf32> to vector<8x8xbf16>
    %cst_35 = arith.constant dense<0.000000e+00> : vector<8x8xf32>
    %126 = tpu.matmul %121, %123, %cst_35 {dimension_numbers = #tpu.dot_dimension_numbers<[1], [1], [0], [0], [0, 0, 1, 0], [], []>} : vector<8x8xbf16>, vector<8x8xbf16>, vector<8x8xf32> -> vector<8x8xf32>
    %cst_36 = arith.constant -1.000000e+30 : f32
    %127 = vector.broadcast %cst_36 : f32 to vector<8x8xf32>
    %128 = arith.select %77, %126, %127 : vector<8x8xi1>, vector<8x8xf32>
    %cst_37 = arith.constant dense<0xFF800000> : vector<8xf32>
    %129 = vector.multi_reduction <maximumf>, %128, %cst_37 [1] : vector<8x8xf32> to vector<8xf32>
    %130 = vector.shape_cast %129 : vector<8xf32> to vector<8x1xf32>
    %131 = vector.broadcast %130 : vector<8x1xf32> to vector<8x8xf32>
    %132 = arith.subf %128, %131 : vector<8x8xf32>
    %133 = math.exp %132 : vector<8x8xf32>
    %cst_38 = arith.constant dense<0.000000e+00> : vector<8xf32>
    %134 = vector.multi_reduction <add>, %133, %cst_38 [1] : vector<8x8xf32> to vector<8xf32>
    %135 = vector.shape_cast %134 : vector<8xf32> to vector<8x1xf32>
    %136 = tpu.reciprocal %135 {approx = true} : vector<8x1xf32> -> vector<8x1xf32>
    %137 = vector.broadcast %136 : vector<8x1xf32> to vector<8x8xf32>
    %138 = arith.mulf %133, %137 : vector<8x8xf32>
    %139 = arith.truncf %138 : vector<8x8xf32> to vector<8x8xbf16>
    %cst_39 = arith.constant dense<0.000000e+00> : vector<8x8xf32>
    %140 = tpu.matmul %139, %125, %cst_39 {dimension_numbers = #tpu.dot_dimension_numbers<[1], [0], [0], [1], [0, 0, 1, 1], [], []>} : vector<8x8xbf16>, vector<8x8xbf16>, vector<8x8xf32> -> vector<8x8xf32>
    %141 = vector.extract_strided_slice %60 {offsets = [0, 24], sizes = [8, 8], strides = [1, 1]} : vector<8x32xf32> to vector<8x8xf32>
    %142 = arith.truncf %141 : vector<8x8xf32> to vector<8x8xbf16>
    %143 = vector.extract_strided_slice %62 {offsets = [0, 24], sizes = [8, 8], strides = [1, 1]} : vector<8x64xf32> to vector<8x8xf32>
    %144 = arith.truncf %143 : vector<8x8xf32> to vector<8x8xbf16>
    %145 = vector.extract_strided_slice %62 {offsets = [0, 56], sizes = [8, 8], strides = [1, 1]} : vector<8x64xf32> to vector<8x8xf32>
    %146 = arith.truncf %145 : vector<8x8xf32> to vector<8x8xbf16>
    %cst_40 = arith.constant dense<0.000000e+00> : vector<8x8xf32>
    %147 = tpu.matmul %142, %144, %cst_40 {dimension_numbers = #tpu.dot_dimension_numbers<[1], [1], [0], [0], [0, 0, 1, 0], [], []>} : vector<8x8xbf16>, vector<8x8xbf16>, vector<8x8xf32> -> vector<8x8xf32>
    %cst_41 = arith.constant -1.000000e+30 : f32
    %148 = vector.broadcast %cst_41 : f32 to vector<8x8xf32>
    %149 = arith.select %77, %147, %148 : vector<8x8xi1>, vector<8x8xf32>
    %cst_42 = arith.constant dense<0xFF800000> : vector<8xf32>
    %150 = vector.multi_reduction <maximumf>, %149, %cst_42 [1] : vector<8x8xf32> to vector<8xf32>
    %151 = vector.shape_cast %150 : vector<8xf32> to vector<8x1xf32>
    %152 = vector.broadcast %151 : vector<8x1xf32> to vector<8x8xf32>
    %153 = arith.subf %149, %152 : vector<8x8xf32>
    %154 = math.exp %153 : vector<8x8xf32>
    %cst_43 = arith.constant dense<0.000000e+00> : vector<8xf32>
    %155 = vector.multi_reduction <add>, %154, %cst_43 [1] : vector<8x8xf32> to vector<8xf32>
    %156 = vector.shape_cast %155 : vector<8xf32> to vector<8x1xf32>
    %157 = tpu.reciprocal %156 {approx = true} : vector<8x1xf32> -> vector<8x1xf32>
    %158 = vector.broadcast %157 : vector<8x1xf32> to vector<8x8xf32>
    %159 = arith.mulf %154, %158 : vector<8x8xf32>
    %160 = arith.truncf %159 : vector<8x8xf32> to vector<8x8xbf16>
    %cst_44 = arith.constant dense<0.000000e+00> : vector<8x8xf32>
    %161 = tpu.matmul %160, %146, %cst_44 {dimension_numbers = #tpu.dot_dimension_numbers<[1], [0], [0], [1], [0, 0, 1, 1], [], []>} : vector<8x8xbf16>, vector<8x8xbf16>, vector<8x8xf32> -> vector<8x8xf32>
    %162 = tpu.concatenate %98, %119, %140, %161 in 1 : vector<8x8xf32>, vector<8x8xf32>, vector<8x8xf32>, vector<8x8xf32> -> vector<8x32xf32>
    %163 = arith.truncf %162 : vector<8x32xf32> to vector<8x32xbf16>
    %c0_45 = arith.constant 0 : index
    %c0_46 = arith.constant 0 : index
    %164 = vector.load %arg6[%c0_45, %c0_46] : memref<32x32xbf16, #tpu.memory_space<vmem>>, vector<32x32xbf16>
    %cst_47 = arith.constant dense<0.000000e+00> : vector<8x32xf32>
    %165 = tpu.matmul %163, %164, %cst_47 {dimension_numbers = #tpu.dot_dimension_numbers<[1], [0], [0], [1], [0, 0, 1, 1], [], []>} : vector<8x32xbf16>, vector<32x32xbf16>, vector<8x32xf32> -> vector<8x32xf32>
    %166 = vector.broadcast %4 : vector<1x32xf32> to vector<8x32xf32>
    %167 = arith.addf %165, %166 : vector<8x32xf32>
    %168 = arith.truncf %167 : vector<8x32xf32> to vector<8x32xbf16>
    %c0_48 = arith.constant 0 : index
    %c0_49 = arith.constant 0 : index
    %169 = vector.load %arg7[%c0_48, %c0_49] : memref<32x256xbf16, #tpu.memory_space<vmem>>, vector<32x256xbf16>
    %cst_50 = arith.constant dense<0.000000e+00> : vector<8x256xf32>
    %170 = tpu.matmul %168, %169, %cst_50 {dimension_numbers = #tpu.dot_dimension_numbers<[1], [0], [0], [1], [0, 0, 1, 1], [], []>} : vector<8x32xbf16>, vector<32x256xbf16>, vector<8x256xf32> -> vector<8x256xf32>
    %171 = vector.broadcast %5 : vector<1x256xf32> to vector<8x256xf32>
    %172 = arith.addf %170, %171 : vector<8x256xf32>
    %c0_51 = arith.constant 0 : index
    %c0_52 = arith.constant 0 : index
    %173 = vector.load %arg8[%c0_51, %c0_52] : memref<8x256xf32, #tpu.memory_space<vmem>>, vector<8x256xf32>
    tpu.vector_store %arg8[%c0_51, %c0_52], %172 {strides = array<i32>} : memref<8x256xf32, #tpu.memory_space<vmem>>, vector<8x256xf32>,
    return
  }
  func.func @transform_0(%arg0: i32) -> (i32, i32) {
    %c0_i32 = arith.constant 0 : i32
    %c0_i32_0 = arith.constant 0 : i32
    %c0_i32_1 = arith.constant 0 : i32
    return %c0_i32, %c0_i32_0 : i32, i32
  }
  func.func @transform_1(%arg0: i32) -> (i32, i32) {
    %c0_i32 = arith.constant 0 : i32
    %c0_i32_0 = arith.constant 0 : i32
    %c0_i32_1 = arith.constant 0 : i32
    return %c0_i32, %c0_i32_0 : i32, i32
  }
  func.func @transform_2(%arg0: i32) -> (i32, i32) {
    %c0_i32 = arith.constant 0 : i32
    %c0_i32_0 = arith.constant 0 : i32
    %c0_i32_1 = arith.constant 0 : i32
    return %c0_i32, %c0_i32_0 : i32, i32
  }
  func.func @transform_3(%arg0: i32) -> (i32, i32) {
    %c0_i32 = arith.constant 0 : i32
    %c0_i32_0 = arith.constant 0 : i32
    %c0_i32_1 = arith.constant 0 : i32
    return %c0_i32, %c0_i32_0 : i32, i32
  }
  func.func @transform_4(%arg0: i32) -> (i32, i32) {
    %c0_i32 = arith.constant 0 : i32
    %c0_i32_0 = arith.constant 0 : i32
    %c0_i32_1 = arith.constant 0 : i32
    return %c0_i32, %c0_i32_0 : i32, i32
  }
  func.func @transform_5(%arg0: i32) -> (i32, i32) {
    %c0_i32 = arith.constant 0 : i32
    %c0_i32_0 = arith.constant 0 : i32
    %c0_i32_1 = arith.constant 0 : i32
    return %c0_i32, %c0_i32_0 : i32, i32
  }
  func.func @transform_6(%arg0: i32) -> (i32, i32) {
    %c0_i32 = arith.constant 0 : i32
    %c0_i32_0 = arith.constant 0 : i32
    %c0_i32_1 = arith.constant 0 : i32
    return %c0_i32, %c0_i32_0 : i32, i32
  }
  func.func @transform_7(%arg0: i32) -> (i32, i32) {
    %c0_i32 = arith.constant 0 : i32
    %c0_i32_0 = arith.constant 0 : i32
    %c0_i32_1 = arith.constant 0 : i32
    return %c0_i32, %c0_i32_0 : i32, i32
  }
}

</mosaic_0001>

<bundles_post_ra>
// kernel: tpu_custom_call.1
= control target key start
LH: loop header
LB: loop body
LE: loop exit
PB: predicated region body
PF: predicated region fallthrough
CT: control target
= control target key end

     0   :  { %s1186_s0 = inlined_call_operand.vmem [shape: f32[16,256], index: 0, kind: input, shape index: {}]   ;;  %s1187_s1 = inlined_call_operand.vmem [shape: f32[16,32], index: 1, kind: input, shape index: {}]   ;;  %s1188_s2 = inlined_call_operand.vmem [shape: f32[8,256], index: 2, kind: input, shape index: {}]   ;;  %s1189_s3 = inlined_call_operand.vmem [shape: bf16[256,32], index: 3, kind: input, shape index: {}]   ;;  %s1190_s4 = inlined_call_operand.vmem [shape: bf16[32,96], index: 4, kind: input, shape index: {}]   ;;  %s1191_s5 = inlined_call_operand.vmem [shape: bf16[32,32], index: 5, kind: input, shape index: {}]   ;;  %s1192_s6 = inlined_call_operand.vmem [shape: bf16[32,256], index: 6, kind: input, shape index: {}]   ;;  %s1193_s7 = inlined_call_operand.hbm [shape: f32[8,256], index: 7, kind: output, shape index: {}]  }
   0x1   :  { %v30_v0 = vld [vmem:[%s1186_s0] sm:$0xff]  ;;  %v31_v1 = vld [vmem:[%s1186_s0 + $0x8] sm:$0xff] }
   0x2   :  { %v34_v2 = vadd.f32 %v31_v1, %v30_v0 }
   0x3   :  { %12 = vsyncpa [#allocation3], 0  ;;  %v32_v3 = vld [vmem:[%s1186_s0 + $0x10] sm:$0xff]  ;;  %v33_v4 = vld [vmem:[%s1186_s0 + $0x18] sm:$0xff]  ;;  %v936_v6 = vmov 256.0   ;;  %vm250_vm7 = vcmask 261120  }
   0x4   :  { %35 = vadd.xlane.f32.xlu0 %v34_v2  ;;  %v37_v5 = vadd.f32 %v33_v4, %v32_v3  ;;  %882 = vrcp.f32 %v936_v6  ;;  %v852_v27 = vld [vmem:[%s1189_s3 + $0x38] sm:$0xff]  ;;  %v851_v29 = vld [vmem:[%s1189_s3 + $0x30] sm:$0xff]  ;;  %v850_v31 = vld [vmem:[%s1189_s3 + $0x28] sm:$0xff]  ;;  %s938_s19 = smov 96   ;;  %vm383_vm15 = vcmask 64512   ;;  %s939_s25 = smov 104  }
   0x5   :  { %v860_v28 = vld [vmem:[%s1189_s3 + $0x78] sm:$0xff]  ;;  %222 = vmatpush.bf16.msra.mxu0 %v852_v27  ;;  %v859_v30 = vld [vmem:[%s1189_s3 + $0x70] sm:$0xff]  ;;  %v858_v32 = vld [vmem:[%s1189_s3 + $0x68] sm:$0xff]  ;;  %s940_s26 = smov 120   ;;  %s942_s27 = smov 88  }
   0x6   :  { %236 = vmatpush.bf16.msra.mxu1 %v860_v28  ;;  %v849_v33 = vld [vmem:[%s1189_s3 + $0x20] sm:$0xff]  ;;  %v848_v35 = vld [vmem:[%s1189_s3 + $0x18] sm:$0xff]  ;;  %v847_v37 = vld [vmem:[%s1189_s3 + $0x10] sm:$0xff]  ;;  %s943_s28 = smov 72   ;;  %s944_s29 = smov 80  }
   0x7   :  { %v857_v34 = vld [vmem:[%s1189_s3 + $0x60] sm:$0xff]  ;;  %v856_v36 = vld [vmem:[%s1189_s3 + $0x58] sm:$0xff]  ;;  %v855_v38 = vld [vmem:[%s1189_s3 + $0x50] sm:$0xff]  ;;  %s945_s30 = smov 8   ;;  %s946_s8 = smov 16  }
   0x8   :  { %v846_v39 = vld [vmem:[%s1189_s3 + $0x8] sm:$0xff]  ;;  %v845_v41 = vld [vmem:[%s1189_s3] sm:$0xff]  ;;  %s947_s0 = smov 24  }
   0x9   :  { %223 = vmatpush.bf16.msra.mxu0 %v851_v29  ;;  %v854_v40 = vld [vmem:[%s1189_s3 + $0x48] sm:$0xff]  ;;  %v853_v42 = vld [vmem:[%s1189_s3 + $0x40] sm:$0xff] }
   0xa   :  { %v883_v7 = vpop.eup %882  ;;  %237 = vmatpush.bf16.msra.mxu1 %v859_v30 }
   0xb   :  { %v41_v8 = vmul.f32 256.0, %v883_v7  ;;  %vm45_vm0 = vweird.f32 %v883_v7 }
   0xc   :  { %38 = vadd.xlane.f32.xlu0 %v37_v5 }
   0xd   :  { %v42_v9 = vsub.f32 1.0, %v41_v8  ;;  %224 = vmatpush.bf16.msra.mxu0 %v850_v31 }
   0xe   :  { %238 = vmatpush.bf16.msra.mxu1 %v858_v32 }
   0xf   :  { %v43_v10 = vmul.f32 %v883_v7, %v42_v9 }
  0x11   :  { %v44_v11 = vadd.f32 %v883_v7, %v43_v10  ;;  %225 = vmatpush.bf16.msra.mxu0 %v849_v33 }
  0x12   :  { %239 = vmatpush.bf16.msra.mxu1 %v857_v34 }
  0x13   :  { %v46_v12 = vsel %vm45_vm0, %v883_v7, %v44_v11  ;;  %v1072_v7 = vld [vmem:[%s1188_s2] sm:$0xff] }
  0x14   :  { %v125_v8 = vperm.slane %v1072_v7, 0 }
  0x15   :  { %226 = vmatpush.bf16.msra.mxu0 %v848_v35 }
  0x16   :  { %240 = vmatpush.bf16.msra.mxu1 %v856_v36 }
  0x19   :  { %227 = vmatpush.bf16.msra.mxu0 %v847_v37 }
  0x1a   :  { %241 = vmatpush.bf16.msra.mxu1 %v855_v38 }
  0x1d   :  { %228 = vmatpush.bf16.msra.mxu0 %v846_v39 }
  0x1e   :  { %242 = vmatpush.bf16.msra.mxu1 %v854_v40 }
  0x21   :  { %229 = vmatpush.bf16.msra.mxu0 %v845_v41 }
  0x22   :  { %243 = vmatpush.bf16.msra.mxu1 %v853_v42 }
  0x77   :  { %v36_v13 = vpop.xlane.xlu0 %35 }
  0x78   :  { %v47_v14 = vmul.f32 %v46_v12, %v36_v13 }
  0x7a   :  { %v1001_v15 = vsub.f32 %v30_v0, %v47_v14  ;;  %v1003_v16 = vsub.f32 %v31_v1, %v47_v14 }
  0x7c   :  { %v53_v17 = vmul.f32 %v1001_v15, %v1001_v15  ;;  %v54_v18 = vmul.f32 %v1003_v16, %v1003_v16 }
  0x7e   :  { %v57_v19 = vadd.f32 %v54_v18, %v53_v17  ;;  %v937_v17 = vmov 32.0  }
  0x7f   :  { %v39_v20 = vpop.xlane.xlu0 %38 }
  0x80   :  { %v48_v21 = vmul.f32 %v46_v12, %v39_v20  ;;  %58 = vadd.xlane.f32.xlu1 %v57_v19 }
  0x82   :  { %v1009_v22 = vsub.f32 %v32_v3, %v48_v21  ;;  %v1011_v23 = vsub.f32 %v33_v4, %v48_v21 }
  0x84   :  { %v55_v24 = vmul.f32 %v1009_v22, %v1009_v22  ;;  %v56_v25 = vmul.f32 %v1011_v23, %v1011_v23 }
  0x86   :  { %v60_v26 = vadd.f32 %v56_v25, %v55_v24 }
  0x88   :  { %61 = vadd.xlane.f32.xlu1 %v60_v26  ;;  %v861_v26 = vld [vmem:[%s1190_s4] sm:$0xff] }
  0xf3   :  { %v59_v43 = vpop.xlane.xlu1 %58 }
  0xf4   :  { %v63_v44 = vmul.f32 %v59_v43, %v46_v12 }
  0xf6   :  { %v65_v45 = vadd.f32 1e-05, %v63_v44 }
  0xf8   :  { %884 = vrsqrt.f32 %v65_v45  ;;  %vm73_vm2 = vweird.f32 %v65_v45 }
  0xfb   :  { %v62_v46 = vpop.xlane.xlu1 %61 }
  0xfc   :  { %v64_v47 = vmul.f32 %v62_v46, %v46_v12 }
  0xfe   :  { %v885_v48 = vpop.eup %884  ;;  %v66_v49 = vadd.f32 1e-05, %v64_v47 }
  0xff   :  { %v68_v50 = vmul.f32 %v885_v48, %v65_v45  ;;  %vm74_vm1 = vweird.f32 %v885_v48 }
 0x100   :  { %886 = vrsqrt.f32 %v66_v49  ;;  %vm75_vm4 = vmor %vm73_vm2, %vm74_vm1  ;;  %vm83_vm5 = vweird.f32 %v66_v49  ;;  %vm422_vm1 = vcmask 1043456   ;;  %vm624_vm2 = vcmask 130048  }
 0x101   :  { %v69_v51 = vmul.f32 %v885_v48, %v68_v50  ;;  %888 = vrcp.f32 %v937_v17 }
 0x103   :  { %v70_v52 = vmul.f32 0.5, %v69_v51 }
 0x105   :  { %v71_v54 = vsub.f32 1.5, %v70_v52  ;;  %v302_v52 = vperm.slane %v1072_v7, 1 }
 0x106   :  { %v887_v53 = vpop.eup %886 }
 0x107   :  { %v78_v55 = vmul.f32 %v887_v53, %v66_v49  ;;  %v72_v58 = vmul.f32 %v885_v48, %v71_v54  ;;  %vm84_vm3 = vweird.f32 %v887_v53  ;;  %v889_v18 = vpop.eup %888 }
 0x108   :  { %vm85_vm6 = vmor %vm83_vm5, %vm84_vm3  ;;  %v258_v19 = vmul.f32 32.0, %v889_v18  ;;  %vm262_vm8 = vweird.f32 %v889_v18  ;;  %vm626_vm3 = vcmask 195584  }
 0x109   :  { %v79_v56 = vmul.f32 %v887_v53, %v78_v55  ;;  %v76_v60 = vsel %vm75_vm4, %v885_v48, %v72_v58 }
 0x10a   :  { %v87_v63 = vmul.f32 %v76_v60, %v1001_v15  ;;  %v88_v1 = vmul.f32 %v76_v60, %v1003_v16  ;;  %v259_v20 = vsub.f32 1.0, %v258_v19  ;;  %v309_v60 = vld [vmem:[%s1187_s1 + $0x8] sm:$0xff] }
 0x10b   :  { %v80_v57 = vmul.f32 0.5, %v79_v56  ;;  %v305_v56 = vperm.slane %v1072_v7, 2 }
 0x10c   :  { %v260_v21 = vmul.f32 %v889_v18, %v259_v20 }
 0x10d   :  { %v81_v59 = vsub.f32 1.5, %v80_v57 }
 0x10f   :  { %v82_v61 = vmul.f32 %v887_v53, %v81_v59 }
 0x111   :  { %v86_v62 = vsel %vm85_vm6, %v887_v53, %v82_v61 }
 0x112   :  { %v89_v0 = vmul.f32 %v86_v62, %v1009_v22  ;;  %v90_v2 = vmul.f32 %v86_v62, %v1011_v23  ;;  %v261_v22 = vadd.f32 %v889_v18, %v260_v21  ;;  %v862_v23 = vld [vmem:[%s1190_s4 + $0x8] sm:$0xff] }
 0x113   :  { %339 = vmatpush.bf16.msra.mxu2 %v862_v23 }
 0x114   :  { %v91_v3 = vpack.c.bf16 %v89_v0, %v87_v63  ;;  %v92_v4 = vpack.c.bf16 %v90_v2, %v88_v1  ;;  %v263_v24 = vsel %vm262_vm8, %v889_v18, %v261_v22  ;;  %v368_v18 = vlaneseq }
 0x116   :  { %230 = vmatmul.bf16.vlgmr.msra.gmra.mxu0 %v91_v3  ;;  %244 = vmatmul.bf16.vlgmr.msra.gmra.mxu1 %v92_v4  ;;  %v308_v4 = vld [vmem:[%s1187_s1] sm:$0xff]  ;;  %s941_s1 = smov 112   ;;  %v369_v21 = vshrl.u32 %v368_v18, 7  ;;  %v372_v22 = vand.u32 127, %v368_v18 }
 0x117   :  { %340 = vmatpush.bf16.msra.mxu2 %v861_v26 }
 0x193   :  { %v231_v5 = vpop.f32.mrf.mxu0  ;;  %v245_v6 = vpop.f32.mrf.mxu1 }
 0x194   :  { %v232_v13 = vadd.f32 %v231_v5, %v125_v8 }
 0x196   :  { %v246_v15 = vadd.f32 %v245_v6, %v232_v13 }
 0x198   :  { %v251_v16 = vsel %vm250_vm7, %v246_v15, 0.0 }
 0x19b   :  { %v233_v9 = vpop.f32.mrf.mxu0  ;;  %v247_v11 = vpop.f32.mrf.mxu1 }
 0x19c   :  { %v234_v10 = vadd.f32 %v233_v9, %v125_v8 }
 0x19e   :  { %v248_v12 = vadd.f32 %v247_v11, %v234_v10 }
 0x1a0   :  { %v254_v14 = vsel %vm250_vm7, %v248_v12, 0.0 }
 0x1a1   :  { %255 = vadd.xlane.f32.xlu2 %v254_v14 }
 0x1a9   :  { %252 = vadd.xlane.f32.xlu2 %v251_v16 }
 0x1c1   :  { %348 = vrot.lane.b32.xlu2 %v862_v23, %s938_s19 }
 0x214   :  { %v256_v25 = vpop.xlane.xlu2 %255 }
 0x215   :  { %v265_v27 = vmul.f32 %v263_v24, %v256_v25  ;;  %v373_v25 = vcvt.s32.f32 %v372_v22 }
 0x217   :  { %v267_v28 = vsub.f32 %v248_v12, %v265_v27 }
 0x219   :  { %v269_v29 = vmul.f32 %v267_v28, %v267_v28 }
 0x21b   :  { %v273_v30 = vsel %vm250_vm7, %v269_v29, 0.0  ;;  %v377_v29 = vadd.f32 0.5, %v373_v25 }
 0x21c   :  { %274 = vadd.xlane.f32.xlu0 %v273_v30  ;;  %v253_v31 = vpop.xlane.xlu2 %252 }
 0x21d   :  { %v264_v32 = vmul.f32 %v263_v24, %v253_v31  ;;  %v378_v31 = vmul.f32 0.25, %v377_v29 }
 0x21f   :  { %v266_v33 = vsub.f32 %v246_v15, %v264_v32 }
 0x221   :  { %v268_v34 = vmul.f32 %v266_v33, %v266_v33 }
 0x223   :  { %v270_v35 = vsel %vm250_vm7, %v268_v34, 0.0  ;;  %v379_v34 = vfloor.f32 %v378_v31 }
 0x224   :  { %271 = vadd.xlane.f32.xlu1 %v270_v35  ;;  %v349_v36 = vpop.permute.xlu2 %348 }
 0x225   :  { %361 = vmatpush.bf16.msra.mxu3 %v349_v36 }
 0x230   :  { %346 = vrot.lane.b32.xlu0 %v861_v26, %s938_s19 }
 0x28f   :  { %v275_v37 = vpop.xlane.xlu0 %274 }
 0x290   :  { %v277_v38 = vmul.f32 %v275_v37, %v263_v24 }
 0x292   :  { %v279_v39 = vadd.f32 1e-05, %v277_v38 }
 0x294   :  { %890 = vrsqrt.f32 %v279_v39  ;;  %vm296_vm10 = vweird.f32 %v279_v39 }
 0x297   :  { %v272_v40 = vpop.xlane.xlu1 %271 }
 0x298   :  { %v276_v41 = vmul.f32 %v272_v40, %v263_v24  ;;  %v370_v24 = vcvt.s32.f32 %v369_v21 }
 0x29a   :  { %v891_v42 = vpop.eup %890  ;;  %v278_v43 = vadd.f32 1e-05, %v276_v41 }
 0x29b   :  { %v291_v44 = vmul.f32 %v891_v42, %v279_v39  ;;  %vm297_vm9 = vweird.f32 %v891_v42 }
 0x29c   :  { %892 = vrsqrt.f32 %v278_v43  ;;  %vm298_vm11 = vmor %vm296_vm10, %vm297_vm9  ;;  %vm286_vm13 = vweird.f32 %v278_v43 }
 0x29d   :  { %v292_v45 = vmul.f32 %v891_v42, %v291_v44 }
 0x29f   :  { %v293_v46 = vmul.f32 0.5, %v292_v45 }
 0x2a1   :  { %v294_v47 = vsub.f32 1.5, %v293_v46 }
 0x2a2   :  { %v893_v48 = vpop.eup %892  ;;  %v347_v49 = vpop.permute.xlu0 %346 }
 0x2a3   :  { %v295_v50 = vmul.f32 %v891_v42, %v294_v47  ;;  %v281_v51 = vmul.f32 %v893_v48, %v278_v43  ;;  %362 = vmatpush.bf16.msra.mxu3 %v347_v49  ;;  %vm287_vm12 = vweird.f32 %v893_v48 }
 0x2a4   :  { %vm288_vm14 = vmor %vm286_vm13, %vm287_vm12 }
 0x2a5   :  { %v299_v53 = vsel %vm298_vm11, %v891_v42, %v295_v50  ;;  %v282_v54 = vmul.f32 %v893_v48, %v281_v51 }
 0x2a6   :  { %v301_v55 = vmul.f32 %v299_v53, %v267_v28  ;;  %v374_v28 = vadd.f32 0.5, %v370_v24 }
 0x2a7   :  { %v283_v57 = vmul.f32 0.5, %v282_v54 }
 0x2a8   :  { %v304_v58 = vmul.f32 %v302_v52, %v301_v55  ;;  %v375_v30 = vmul.f32 0.25, %v374_v28 }
 0x2a9   :  { %v284_v59 = vsub.f32 1.5, %v283_v57 }
 0x2aa   :  { %v307_v61 = vadd.f32 %v305_v56, %v304_v58 }
 0x2ab   :  { %v285_v62 = vmul.f32 %v893_v48, %v284_v59 }
 0x2ac   :  { %v311_v63 = vadd.f32 %v309_v60, %v307_v61 }
 0x2ad   :  { %v289_v0 = vsel %vm288_vm14, %v893_v48, %v285_v62 }
 0x2ae   :  { %v300_v1 = vmul.f32 %v289_v0, %v266_v33  ;;  %v313_v2 = vpack.c.bf16 %v311_v63, %v311_v63  ;;  %v376_v33 = vfloor.f32 %v375_v30 }
 0x2b0   :  { %809 = vmatmul.msk.bf16.vlgmr.msra.gmra.mxu3 %vm250_vm7, %v313_v2  ;;  %v303_v3 = vmul.f32 %v302_v52, %v300_v1  ;;  %vm1110_vm0 = vcmp.eq.f32.partialorder %v376_v33, %v379_v34 }
 0x2b2   :  { %v306_v5 = vadd.f32 %v305_v56, %v303_v3 }
 0x2b4   :  { %v310_v6 = vadd.f32 %v308_v4, %v306_v5 }
 0x2b6   :  { %v312_v8 = vpack.c.bf16 %v310_v6, %v310_v6 }
 0x2b8   :  { %808 = vmatmul.msk.bf16.vlgmr.msra.gmra.mxu2 %vm250_vm7, %v312_v8 }
 0x333   :  { %v364_v9 = vpop.f32.mrf.mxu3 }
 0x334   :  { %v1097_v10 = vpack.c.bf16 %v364_v9, %v364_v9 }
 0x336   :  { %556 = vrot.lane.b32.xlu0 %v1097_v10, %s939_s25  ;;  %442 = vrot.lane.b32.xlu1 %v1097_v10, %s940_s26  ;;  %v388_v11 = vsel %vm383_vm15, %v1097_v10, 0 }
 0x337   :  { %397 = vmatpush.bf16.xpose.msrb.mxu2 %v388_v11 }
 0x33b   :  { %v342_v12 = vpop.f32.mrf.mxu2  ;;  %v366_v13 = vpop.f32.mrf.mxu3 }
 0x33c   :  { %v381_v14 = vpack.c.bf16 %v342_v12, %v342_v12 }
 0x33e   :  { %440 = vrot.lane.b32.xlu2 %v381_v14, %s940_s26  ;;  %497 = vrot.lane.b32.xlu0 %v381_v14, %s941_s1 }
 0x33f   :  { %499 = vrot.lane.b32.xlu1 %v1097_v10, %s941_s1  ;;  %810 = vmatmul.msk.bf16.vlgmr.msrb.gmra.mxu2 %vm383_vm15, %v381_v14 }
 0x343   :  { %v344_v15 = vpop.f32.mrf.mxu2 }
 0x346   :  { %554 = vrot.lane.b32.xlu2 %v381_v14, %s939_s25 }
 0x398   :  { %v441_v23 = vpop.permute.xlu2 %440 }
 0x3a0   :  { %v555_v35 = vpop.permute.xlu2 %554 }
 0x3a8   :  { %v557_v16 = vpop.permute.xlu0 %556  ;;  %v443_v17 = vpop.permute.xlu1 %442 }
 0x3a9   :  { %v562_v19 = vsel %vm383_vm15, %v557_v16, 0  ;;  %v448_v20 = vsel %vm383_vm15, %v443_v17, 0 }
 0x3aa   :  { %457 = vmatpush.bf16.xpose.msra.mxu2 %v448_v20 }
 0x3b0   :  { %v498_v32 = vpop.permute.xlu0 %497 }
 0x3b1   :  { %v500_v26 = vpop.permute.xlu1 %499  ;;  %812 = vmatmul.msk.bf16.vlgmr.msra.gmra.mxu2 %vm383_vm15, %v441_v23 }
 0x3b2   :  { %571 = vmatpush.bf16.xpose.msrb.mxu2 %v562_v19  ;;  %v505_v27 = vsel %vm383_vm15, %v500_v26, 0 }
 0x3b3   :  { %514 = vmatpush.bf16.xpose.msrb.mxu0 %v505_v27 }
 0x3ba   :  { %814 = vmatmul.msk.bf16.vlgmr.msrb.gmra.mxu0 %vm383_vm15, %v498_v32 }
 0x3c1   :  { %816 = vmatmul.msk.bf16.vlgmr.msrb.gmra.mxu2 %vm383_vm15, %v555_v35 }
 0x3c2   :  { %v399_v37 = vpop.f32.mrf.mxu2 }
 0x3c3   :  { %v403_v38 = vsel %vm1110_vm0, %v399_v37, -1e+30 }
 0x3c4   :  { %v404_v39 = vsel %vm383_vm15, %v403_v38, -inf }
 0x3c5   :  { %405 = vmax.xlane.f32.xlu2 %v404_v39 }
 0x3ca   :  { %v401_v40 = vpop.f32.mrf.mxu2 }
 0x434   :  { %v459_v41 = vpop.f32.mrf.mxu2 }
 0x435   :  { %v463_v42 = vsel %vm1110_vm0, %v459_v41, -1e+30 }
 0x436   :  { %v464_v43 = vsel %vm383_vm15, %v463_v42, -inf }
 0x437   :  { %v516_v44 = vpop.f32.mrf.mxu0  ;;  %465 = vmax.xlane.f32.xlu1 %v464_v43  ;;  %v863_v43 = vld [vmem:[%s1191_s5] sm:$0xff] }
 0x438   :  { %v520_v45 = vsel %vm1110_vm0, %v516_v44, -1e+30  ;;  %v406_v46 = vpop.xlane.xlu2 %405  ;;  %v837_v44 = vld [vmem:[%s1192_s6 + $0x10] sm:$0xf] }
 0x439   :  { %v407_v47 = vsub.f32 %v403_v38, %v406_v46  ;;  %v521_v48 = vsel %vm383_vm15, %v520_v45, -inf  ;;  %v867_v46 = vld [vmem:[%s1192_s6 + $0x14] sm:$0xf] }
 0x43a   :  { %522 = vmax.xlane.f32.xlu2 %v521_v48  ;;  %v839_v48 = vld [vmem:[%s1192_s6 + $0x18] sm:$0xf0] }
 0x43b   :  { %v408_v49 = vmul.f32 1.442695, %v407_v47 }
 0x43c   :  { %v461_v50 = vpop.f32.mrf.mxu2 }
 0x43d   :  { %894 = vpow2.f32 %v408_v49  ;;  %v842_v49 = vor.u32 %v867_v46, %v839_v48 }
 0x43f   :  { %v518_v51 = vpop.f32.mrf.mxu0  ;;  %711 = vmatpush.bf16.msra.mxu2 %v842_v49 }
 0x443   :  { %v895_v52 = vpop.eup %894 }
 0x444   :  { %v573_v53 = vpop.f32.mrf.mxu2  ;;  %v410_v54 = vsel %vm383_vm15, %v895_v52, 0.0 }
 0x445   :  { %v577_v55 = vsel %vm1110_vm0, %v573_v53, -1e+30  ;;  %411 = vadd.xlane.f32.xlu1 %v410_v54 }
 0x446   :  { %v578_v56 = vsel %vm383_vm15, %v577_v55, -inf }
 0x447   :  { %579 = vmax.xlane.f32.xlu0 %v578_v56 }
 0x44c   :  { %v575_v57 = vpop.f32.mrf.mxu2 }
 0x44d   :  { %v829_v57 = vld [vmem:[%s1192_s6] sm:$0xf] }
 0x45b   :  { %417 = vrot.lane.b32.xlu0 %v1097_v10, %s938_s19 }
 0x45e   :  { %476 = vrot.lane.b32.xlu1 %v1097_v10, %s942_s27 }
 0x463   :  { %590 = vrot.lane.b32.xlu0 %v1097_v10, %s943_s28 }
 0x4aa   :  { %v466_v58 = vpop.xlane.xlu1 %465 }
 0x4ab   :  { %v467_v61 = vsub.f32 %v463_v42, %v466_v58  ;;  %v864_v42 = vld [vmem:[%s1191_s5 + $0x8] sm:$0xff] }
 0x4ac   :  { %655 = vmatpush.bf16.msra.mxu0 %v864_v42  ;;  %v866_v58 = vld [vmem:[%s1192_s6 + $0x4] sm:$0xf0] }
 0x4ad   :  { %v523_v59 = vpop.xlane.xlu2 %522  ;;  %v468_v63 = vmul.f32 1.442695, %v467_v61  ;;  %v831_v61 = vld [vmem:[%s1192_s6 + $0x8] sm:$0xf0] }
 0x4ae   :  { %v524_v60 = vsub.f32 %v520_v45, %v523_v59  ;;  %v868_v45 = vld [vmem:[%s1192_s6 + $0x14] sm:$0xf0]  ;;  %v865_v59 = vld [vmem:[%s1192_s6 + $0x4] sm:$0xf]  ;;  %s948_s6 = smov [#allocation2]  }
 0x4af   :  { %v838_v47 = vor.u32 %v868_v45, %v837_v44  ;;  %s725_s27 = sshll.u32 %s948_s6, 4  ;;  %s726_s27 = int_to_ptr.vmem [resolvable:$true] %s725_s27 }
 0x4b0   :  { %v525_v62 = vmul.f32 1.442695, %v524_v60  ;;  %656 = vmatpush.bf16.msra.mxu0 %v863_v43  ;;  %v830_v60 = vor.u32 %v866_v58, %v829_v57 }
 0x4b2   :  { %896 = vpow2.f32 %v525_v62  ;;  %v834_v62 = vor.u32 %v865_v59, %v831_v61 }
 0x4b3   :  { %898 = vpow2.f32 %v468_v63  ;;  %v633_v63 = vperm.slane %v1072_v7, 3 }
 0x4b4   :  { %712 = vmatpush.bf16.msra.mxu2 %v834_v62 }
 0x4b8   :  { %v897_v0 = vpop.eup %896  ;;  %v412_v6 = vpop.xlane.xlu1 %411 }
 0x4b9   :  { %v527_v1 = vsel %vm383_vm15, %v897_v0, 0.0  ;;  %v899_v5 = vpop.eup %898 }
 0x4ba   :  { %528 = vadd.xlane.f32.xlu2 %v527_v1  ;;  %v580_v2 = vpop.xlane.xlu0 %579  ;;  %v470_v8 = vsel %vm383_vm15, %v899_v5, 0.0 }
 0x4bb   :  { %v581_v3 = vsub.f32 %v577_v55, %v580_v2 }
 0x4bd   :  { %v582_v4 = vmul.f32 1.442695, %v581_v3 }
 0x4bf   :  { %900 = vpow2.f32 %v582_v4  ;;  %v667_v4 = vperm.slane %v1072_v7, 4 }
 0x4c0   :  { %902 = vrcp.f32 %v412_v6  ;;  %v29_v6 = vld [vmem:[%s1188_s2 + $0x8] sm:$0xff] }
 0x4c2   :  { %471 = vadd.xlane.f32.xlu2 %v470_v8 }
 0x4c5   :  { %v901_v9 = vpop.eup %900 }
 0x4c6   :  { %v584_v11 = vsel %vm383_vm15, %v901_v9, 0.0  ;;  %v903_v12 = vpop.eup %902 }
 0x4c7   :  { %v414_v13 = vmul.f32 %v903_v12, %v895_v52 }
 0x4c9   :  { %v415_v18 = vpack.c.bf16 %v414_v13, %v414_v13 }
 0x4ca   :  { %585 = vadd.xlane.f32.xlu2 %v584_v11 }
 0x4cd   :  { %v418_v14 = vpop.permute.xlu0 %417 }
 0x4ce   :  { %v424_v15 = vsel %vm422_vm1, %v418_v14, 0 }
 0x4cf   :  { %433 = vmatpush.bf16.msrb.mxu3 %v424_v15 }
 0x4d0   :  { %v477_v16 = vpop.permute.xlu1 %476 }
 0x4d1   :  { %v482_v17 = vsel %vm422_vm1, %v477_v16, 0 }
 0x4d2   :  { %811 = vmatmul.msk.bf16.vlgmr.msrb.gmra.mxu3 %vm383_vm15, %v415_v18 }
 0x4d3   :  { %491 = vmatpush.bf16.msra.mxu3 %v482_v17 }
 0x4d5   :  { %v591_v19 = vpop.permute.xlu0 %590 }
 0x4d6   :  { %v596_v20 = vsel %vm422_vm1, %v591_v19, 0 }
 0x4d7   :  { %605 = vmatpush.bf16.msrb.mxu3 %v596_v20 }
 0x4e2   :  { %533 = vrot.lane.b32.xlu2 %v1097_v10, %s944_s29 }
 0x52d   :  { %v529_v21 = vpop.xlane.xlu2 %528 }
 0x535   :  { %v472_v22 = vpop.xlane.xlu2 %471 }
 0x536   :  { %904 = vrcp.f32 %v472_v22 }
 0x537   :  { %906 = vrcp.f32 %v529_v21 }
 0x53c   :  { %v905_v23 = vpop.eup %904 }
 0x53d   :  { %v474_v24 = vmul.f32 %v905_v23, %v899_v5  ;;  %v586_v25 = vpop.xlane.xlu2 %585  ;;  %v907_v27 = vpop.eup %906 }
 0x53e   :  { %908 = vrcp.f32 %v586_v25  ;;  %v531_v28 = vmul.f32 %v907_v27, %v897_v0 }
 0x53f   :  { %v475_v26 = vpack.c.bf16 %v474_v24, %v474_v24 }
 0x540   :  { %v532_v32 = vpack.c.bf16 %v531_v28, %v531_v28 }
 0x541   :  { %813 = vmatmul.msk.bf16.vlgmr.msra.gmra.mxu3 %vm383_vm15, %v475_v26 }
 0x544   :  { %v909_v31 = vpop.eup %908 }
 0x545   :  { %v534_v29 = vpop.permute.xlu2 %533  ;;  %v588_v10 = vmul.f32 %v909_v31, %v901_v9  ;;  %v668_v9 = vperm.slane %v29_v6, 4 }
 0x546   :  { %v539_v30 = vsel %vm422_vm1, %v534_v29, 0 }
 0x547   :  { %548 = vmatpush.bf16.msrb.mxu1 %v539_v30  ;;  %v589_v33 = vpack.c.bf16 %v588_v10, %v588_v10 }
 0x54a   :  { %815 = vmatmul.msk.bf16.vlgmr.msrb.gmra.mxu1 %vm383_vm15, %v532_v32 }
 0x54b   :  { %698 = vmatpush.bf16.msra.mxu1 %v838_v47 }
 0x54f   :  { %699 = vmatpush.bf16.msra.mxu1 %v830_v60 }
 0x551   :  { %817 = vmatmul.msk.bf16.vlgmr.msrb.gmra.mxu3 %vm383_vm15, %v589_v33 }
 0x555   :  { %v435_v34 = vpop.f32.mrf.mxu3 }
 0x55d   :  { %v437_v35 = vpop.f32.mrf.mxu3 }
 0x5c4   :  { %v493_v36 = vpop.f32.mrf.mxu3 }
 0x5c5   :  { %612 = vrot.lane.b32.xlu0 %v493_v36, %s945_s30  ;;  %s727_s30 = sshll.u32 %s1193_s7, 4  ;;  %s728_s30 = int_to_ptr.hbm [resolvable:$true] %s727_s30 }
 0x5c7   :  { %v550_v37 = vpop.f32.mrf.mxu1 }
 0x5c8   :  { %616 = vrot.lane.b32.xlu1 %v550_v37, %s946_s8 }
 0x5cc   :  { %v495_v38 = vpop.f32.mrf.mxu3 }
 0x5cf   :  { %v552_v39 = vpop.f32.mrf.mxu1 }
 0x5d4   :  { %v607_v40 = vpop.f32.mrf.mxu3 }
 0x5d5   :  { %620 = vrot.lane.b32.xlu0 %v607_v40, %s947_s0 }
 0x5dc   :  { %v609_v41 = vpop.f32.mrf.mxu3 }
 0x637   :  { %v613_v50 = vpop.permute.xlu0 %612 }
 0x638   :  { %v623_v52 = vsel %vm383_vm15, %v435_v34, %v613_v50 }
 0x63a   :  { %v617_v51 = vpop.permute.xlu1 %616 }
 0x63b   :  { %v625_v53 = vsel %vm624_vm2, %v623_v52, %v617_v51 }
 0x647   :  { %v621_v54 = vpop.permute.xlu0 %620 }
 0x648   :  { %v627_v55 = vsel %vm626_vm3, %v625_v53, %v621_v54 }
 0x649   :  { %v628_v56 = vpack.c.bf16 %v627_v55, %v627_v55 }
 0x64b   :  { %826 = vmatmul.msk.bf16.vlgmr.msra.gmra.mxu0 %vm250_vm7, %v628_v56 }
 0x6c8   :  { %v658_v0 = vpop.f32.mrf.mxu0 }
 0x6c9   :  { %v659_v1 = vadd.f32 %v658_v0, %v633_v63 }
 0x6cb   :  { %v662_v2 = vpack.c.bf16 %v659_v1, %v659_v1 }
 0x6cd   :  { %843 = vmatmul.msk.bf16.vlgmr.msra.gmra.mxu1 %vm250_vm7, %v662_v2  ;;  %844 = vmatmul.msk.bf16.vlgmr.msra.gmra.mxu2 %vm250_vm7, %v662_v2 }
 0x6d0   :  { %v660_v3 = vpop.f32.mrf.mxu0 }
 0x74a   :  { %v701_v5 = vpop.f32.mrf.mxu1 }
 0x74b   :  { %v702_v8 = vadd.f32 %v701_v5, %v667_v4 }
 0x74d   :  { %718 = vst [vmem:[#allocation2] sm:$0xff] %v702_v8 }
 0x750   :  { %v714_v11 = vpop.f32.mrf.mxu2 }
 0x751   :  { %v715_v12 = vadd.f32 %v714_v11, %v668_v9 }
 0x752   :  { %v703_v13 = vpop.f32.mrf.mxu1 }
 0x753   :  { %719 = vst [vmem:[#allocation2 + $0x8] sm:$0xff] %v715_v12 }
 0x754   :  { %730 = dma.vmem_to_hbm [thread:$0]  %s726_s27, 256, %s728_s30, [#allocation3]  }
 0x758   :  { %v716_v7 = vpop.f32.mrf.mxu2 }
 0x759   :  { %934 = dma.done.wait [#allocation3], 256  }
 0x75a   :  { %935 = vsyncadd [#allocation3], 4294967040 }
 0x75b   :  { %735 = vsyncpa [#allocation3], 1 }

</bundles_post_ra>
